<compile_context>
chip_gen: v5e
topology: v5e:2x2
jax: 0.10.0
libtpu: 0.0.40
codegen_flags: <defaults>
</compile_context>

<pallas_src>
import functools

import jax
import jax.numpy as jnp
from jax import lax
from jax.experimental import pallas as pl
from jax.experimental.pallas import tpu as pltpu


def _tv_sum(x, axis, size, use_roll):
    """sum_i |x[..., i+1, ...] - x[..., i, ...]| along `axis`, f32 accumulation."""
    if size <= 1:
        return jnp.float32(0.0)
    if use_roll:
        # XLU rotate instead of misaligned slices (avoids block-sized shifted
        # temporaries).  The same rotate is applied to an index iota; keeping only the
        # positions whose rolled index differs from the local index by exactly 1
        # excludes the circular wrap pair regardless of the rotate direction, and the
        # kept pairs are exactly the (size-1) adjacent pairs of the TV term.
        shifted = pltpu.roll(x, shift=size - 1, axis=axis)
        idx = lax.broadcasted_iota(jnp.int32, x.shape, axis)
        sidx = pltpu.roll(idx, shift=size - 1, axis=axis)
        keep = jnp.abs(sidx - idx) == 1
        diff = jnp.where(keep, jnp.abs(shifted - x), jnp.zeros((), x.dtype))
        return jnp.sum(diff, dtype=jnp.float32)
    # Fallback for lane/sublane-unaligned axis sizes (e.g. W < 128): plain slices.
    lo = [slice(None)] * x.ndim
    hi = [slice(None)] * x.ndim
    lo[axis] = slice(0, size - 1)
    hi[axis] = slice(1, size)
    return jnp.sum(jnp.abs(x[tuple(hi)] - x[tuple(lo)]), dtype=jnp.float32)


def _partial_sums_kernel(est_ref, gt_ref, asym_ref, out_ref, *,
                         mask_mode, h, w, use_roll_h, use_roll_w):
    est = est_ref[...]
    gt = gt_ref[...]
    cdt = est.dtype

    if mask_mode == "scalar":
        a = asym_ref[0].astype(cdt)          # scalar mask from SMEM
    else:
        a = asym_ref[...].astype(cdt)        # (nb,1,h,w) or (nb,bc,h,w); broadcasts

    # |a*est - a*gt| == |a*(est - gt)| exactly -> one fewer multiply per element.
    l1 = jnp.sum(jnp.abs(a * (est - gt)), dtype=jnp.float32)

    # H and W are whole inside every block, so TV diffs never cross a tile boundary.
    h_tv = _tv_sum(est, axis=2, size=h, use_roll=use_roll_h)
    w_tv = _tv_sum(est, axis=3, size=w, use_roll=use_roll_w)

    # Write the three partials into a lane-aligned (1,1,8,128) block (lanes 0..2 of
    # sublane 0 carry the values; the rest is deterministic filler).  Full-block write,
    # no accumulation -> both grid axes can be "parallel" (megacore on v7x).
    lane = lax.broadcasted_iota(jnp.int32, out_ref.shape, 3)
    slab = (jnp.where(lane == 0, l1, 0.0)
            + jnp.where(lane == 1, h_tv, 0.0)
            + jnp.where(lane == 2, w_tv, 0.0))
    out_ref[...] = slab.astype(jnp.float32)


def _choose_blocks(n, c, h, w, itemsize, target_bytes):
    """Largest (nb, bc) divisors of (n, c) with block bytes <= target (C first)."""
    bytes_hw = h * w * itemsize
    bc = 1
    for d in range(1, c + 1):
        if c % d == 0 and d * bytes_hw <= target_bytes:
            bc = d
    nb = 1
    if bc == c:
        for d in range(1, n + 1):
            if n % d == 0 and d * c * bytes_hw <= target_bytes:
                nb = d
    return nb, bc


def _vmem_capacity_bytes():
    """Per-core VMEM capacity; falls back to the smallest (v7x: 64 MiB) if unknown."""
    try:
        cap = int(pltpu.get_tpu_info().vmem_capacity_bytes)
        if cap > 0:
            return min(cap, 128 << 20)
    except Exception:
        pass
    return 64 << 20


def fixed_loss_est2(weight, est_noise, gt_noise, if_asym):
    """JAX/Pallas equivalent of fixed_loss_est2.forward (criterionL1 = L1Loss, mean)."""
    del weight  # unused in the PyTorch forward (kept for signature parity)
    # TODO(synk): criterionL1 is a runtime-passed nn.Module in PyTorch; it is fixed here
    # to nn.L1Loss() (mean reduction), which is how CBDNet invokes this loss.
    n, c, h, w = est_noise.shape
    itemsize = jnp.dtype(est_noise.dtype).itemsize

    # ---- generation-aware tiling / VMEM budget --------------------------------------
    cap = _vmem_capacity_bytes()                       # 64 MiB (v7x) / 128 MiB (v5e/v6e)
    budget = max(cap - (8 << 20), 24 << 20)
    # Footprint per input block: est+gt double-buffered (4x) + mask (<=2x) + ~4 f32
    # temporaries inside the kernel  ->  ~10x block bytes for f32 inputs.
    target_bytes = max(min(budget // 10, 16 << 20), 1 << 20)
    nb, bc = _choose_blocks(n, c, h, w, itemsize, target_bytes)
    grid = (n // nb, c // bc)

    # ---- mask handling: never materialize the channel broadcast in HBM ---------------
    a4 = if_asym
    if a4.ndim < 4:
        a4 = jnp.reshape(a4, (1,) * (4 - a4.ndim) + tuple(a4.shape))
    if a4.size == 1:
        mask_mode = "scalar"
        asym = jnp.reshape(a4, (1,)).astype(jnp.float32)
        asym_spec = pl.BlockSpec(memory_space=pltpu.SMEM)
        asym_blk_bytes = 0
    elif a4.shape[1] == 1:
        mask_mode = "pixel"
        asym = jnp.broadcast_to(a4, (n, 1, h, w))
        if not jnp.issubdtype(asym.dtype, jnp.floating):
            asym = asym.astype(est_noise.dtype)
        asym_spec = pl.BlockSpec((nb, 1, h, w), lambda ni, ci: (ni, 0, 0, 0))
        asym_blk_bytes = nb * h * w * jnp.dtype(asym.dtype).itemsize
    else:
        # TODO(synk): per-channel-only masks could stream through SMEM instead of a
        # full HBM broadcast; rare in CBDNet usage so kept simple here.
        mask_mode = "full"
        asym = jnp.broadcast_to(a4, (n, c, h, w))
        if not jnp.issubdtype(asym.dtype, jnp.floating):
            asym = asym.astype(est_noise.dtype)
        asym_spec = pl.BlockSpec((nb, bc, h, w), lambda ni, ci: (ni, ci, 0, 0))
        asym_blk_bytes = nb * bc * h * w * jnp.dtype(asym.dtype).itemsize

    blk_elems = nb * bc * h * w
    in_blk_bytes = blk_elems * itemsize
    # Double-buffered inputs + mask + ~4 f32-sized in-kernel temporaries + headroom.
    vmem_need = 2 * (2 * in_blk_bytes + asym_blk_bytes) + 4 * blk_elems * 4 + (2 << 20)
    vmem_limit = int(min(max(vmem_need, 32 << 20), cap - (8 << 20)))

    # TV-by-roll only when the axis is sublane/lane aligned (H: 8, W: 128); otherwise
    # fall back to the (correct, small-shape) slice path.
    use_roll_h = (h % 8 == 0)
    use_roll_w = (w % 128 == 0)

    kernel = functools.partial(
        _partial_sums_kernel, mask_mode=mask_mode, h=h, w=w,
        use_roll_h=use_roll_h, use_roll_w=use_roll_w)

    gn, gc = grid
    partials = pl.pallas_call(
        kernel,
        out_shape=jax.ShapeDtypeStruct((gn, gc, 8, 128), jnp.float32),
        grid=grid,
        in_specs=[
            pl.BlockSpec((nb, bc, h, w), lambda ni, ci: (ni, ci, 0, 0)),
            pl.BlockSpec((nb, bc, h, w), lambda ni, ci: (ni, ci, 0, 0)),
            asym_spec,
        ],
        out_specs=pl.BlockSpec((1, 1, 8, 128), lambda ni, ci: (ni, ci, 0, 0)),
        compiler_params=pltpu.CompilerParams(
            dimension_semantics=("parallel", "parallel"),
            vmem_limit_bytes=vmem_limit,
        ),
    )(est_noise, gt_noise, asym)

    # Final (tiny) reduction + all scaling done once in the wrapper.
    l1_sum = jnp.sum(partials[:, :, 0, 0])
    h_tv = jnp.sum(partials[:, :, 0, 1])
    w_tv = jnp.sum(partials[:, :, 0, 2])

    asym_loss = l1_sum / jnp.float32(n * c * h * w)
    count_h = jnp.float32(c * (h - 1) * w)
    count_w = jnp.float32(c * h * (w - 1))
    tvloss = h_tv / count_h + w_tv / count_w
    return asym_loss + tvloss * jnp.float32(0.001)


if __name__ == "__main__":
    key = jax.random.PRNGKey(0)
    k1, k2, k3 = jax.random.split(key, 3)

    N, C, H, W = 2, 4, 16, 16
    est_noise = jax.random.normal(k1, (N, C, H, W), jnp.float32) * 0.1
    gt_noise = jax.random.normal(k2, (N, C, H, W), jnp.float32) * 0.1
    # if_asym: per-pixel 0/1 mask broadcast over channels (as in CBDNet usage)
    if_asym = (jax.random.uniform(k3, (N, 1, H, W)) > 0.5).astype(jnp.float32)
    weight = jnp.ones((1,), jnp.float32)  # unused, kept for signature parity

    loss = fixed_loss_est2(weight, est_noise, gt_noise, if_asym)
    loss = jax.block_until_ready(loss)

    # Pure-JAX reference (mirrors the PyTorch fixed_loss_est2 math exactly).
    a = jnp.broadcast_to(if_asym, est_noise.shape)
    asym_loss = jnp.mean(jnp.abs(a * est_noise - a * gt_noise))
    h_tv = jnp.sum(jnp.abs(est_noise[:, :, 1:, :] - est_noise[:, :, :-1, :]))
    w_tv = jnp.sum(jnp.abs(est_noise[:, :, :, 1:] - est_noise[:, :, :, :-1]))
    ref = asym_loss + (h_tv / (C * (H - 1) * W) + w_tv / (C * H * (W - 1))) * 0.001

    assert jnp.allclose(loss, ref, rtol=1e-4, atol=1e-6), (loss, ref)
    print("KERNEL_OK")
</pallas_src>

<mosaic_0001>
module attributes {stable_mosaic.version = 11 : i64} {
  func.func @_partial_sums_kernel(%arg0: i32, %arg1: i32, %arg2: memref<2x4x16x16xf32, #tpu.memory_space<vmem>>, %arg3: memref<2x4x16x16xf32, #tpu.memory_space<vmem>>, %arg4: memref<2x1x16x16xf32, #tpu.memory_space<vmem>>, %arg5: memref<1x1x8x128xf32, #tpu.memory_space<vmem>>) attributes {dimension_semantics = [#tpu.dimension_semantics<parallel>, #tpu.dimension_semantics<parallel>], iteration_bounds = array<i64: 1, 1>, scalar_prefetch = 0 : i64, scratch_operands = 0 : i64, tpu.core_type = #tpu.core_type<tc>, window_params = [{transform_indices = @transform_0, window_bounds = array<i64: 2, 4, 16, 16>}, {transform_indices = @transform_1, window_bounds = array<i64: 2, 4, 16, 16>}, {transform_indices = @transform_2, window_bounds = array<i64: 2, 1, 16, 16>}, {transform_indices = @transform_3, window_bounds = array<i64: 1, 1, 8, 128>}]} {
    %c0 = arith.constant 0 : index
    %c0_0 = arith.constant 0 : index
    %c0_1 = arith.constant 0 : index
    %c0_2 = arith.constant 0 : index
    %0 = vector.load %arg2[%c0, %c0_0, %c0_1, %c0_2] : memref<2x4x16x16xf32, #tpu.memory_space<vmem>>, vector<2x4x16x16xf32>
    %c0_3 = arith.constant 0 : index
    %c0_4 = arith.constant 0 : index
    %c0_5 = arith.constant 0 : index
    %c0_6 = arith.constant 0 : index
    %1 = vector.load %arg3[%c0_3, %c0_4, %c0_5, %c0_6] : memref<2x4x16x16xf32, #tpu.memory_space<vmem>>, vector<2x4x16x16xf32>
    %c0_7 = arith.constant 0 : index
    %c0_8 = arith.constant 0 : index
    %c0_9 = arith.constant 0 : index
    %c0_10 = arith.constant 0 : index
    %2 = vector.load %arg4[%c0_7, %c0_8, %c0_9, %c0_10] : memref<2x1x16x16xf32, #tpu.memory_space<vmem>>, vector<2x1x16x16xf32>
    %3 = arith.subf %0, %1 : vector<2x4x16x16xf32>
    %4 = vector.broadcast %2 : vector<2x1x16x16xf32> to vector<2x4x16x16xf32>
    %5 = arith.mulf %4, %3 : vector<2x4x16x16xf32>
    %6 = math.absf %5 : vector<2x4x16x16xf32>
    %7 = vector.shape_cast %6 : vector<2x4x16x16xf32> to vector<1x2x4x16x16xf32>
    %cst = arith.constant dense<0.000000e+00> : vector<1xf32>
    %8 = vector.multi_reduction <add>, %7, %cst [1, 2, 3, 4] : vector<1x2x4x16x16xf32> to vector<1xf32>
    %9 = vector.shape_cast %8 : vector<1xf32> to vector<1x1x1x1x1xf32>
    %10 = vector.extract %9[0, 0, 0, 0, 0] : f32 from vector<1x1x1x1x1xf32>
    %c15_i32 = arith.constant 15 : i32
    %11 = tpu.dynamic_rotate %0 by %c15_i32 dim 2 : vector<2x4x16x16xf32>, i32 -> vector<2x4x16x16xf32>
    %12 = tpu.iota {dimensions = array<i32: 2>} : vector<2x4x16x16xi32>
    %c15_i32_11 = arith.constant 15 : i32
    %13 = tpu.dynamic_rotate %12 by %c15_i32_11 dim 2 : vector<2x4x16x16xi32>, i32 -> vector<2x4x16x16xi32>
    %14 = arith.subi %13, %12 : vector<2x4x16x16xi32>
    %15 = math.absi %14 : vector<2x4x16x16xi32>
    %c1_i32 = arith.constant 1 : i32
    %16 = vector.broadcast %c1_i32 : i32 to vector<2x4x16x16xi32>
    %17 = arith.cmpi eq, %15, %16 : vector<2x4x16x16xi32>
    %18 = arith.subf %11, %0 : vector<2x4x16x16xf32>
    %19 = math.absf %18 : vector<2x4x16x16xf32>
    %cst_12 = arith.constant 0.000000e+00 : f32
    %20 = vector.broadcast %cst_12 : f32 to vector<2x4x16x16xf32>
    %21 = arith.select %17, %19, %20 : vector<2x4x16x16xi1>, vector<2x4x16x16xf32>
    %22 = vector.shape_cast %21 : vector<2x4x16x16xf32> to vector<1x2x4x16x16xf32>
    %cst_13 = arith.constant dense<0.000000e+00> : vector<1xf32>
    %23 = vector.multi_reduction <add>, %22, %cst_13 [1, 2, 3, 4] : vector<1x2x4x16x16xf32> to vector<1xf32>
    %24 = vector.shape_cast %23 : vector<1xf32> to vector<1x1x1x1x1xf32>
    %25 = vector.extract %24[0, 0, 0, 0, 0] : f32 from vector<1x1x1x1x1xf32>
    %26 = vector.extract_strided_slice %0 {offsets = [0, 0, 0, 1], sizes = [2, 4, 16, 15], strides = [1, 1, 1, 1]} : vector<2x4x16x16xf32> to vector<2x4x16x15xf32>
    %27 = vector.extract_strided_slice %0 {offsets = [0, 0, 0, 0], sizes = [2, 4, 16, 15], strides = [1, 1, 1, 1]} : vector<2x4x16x16xf32> to vector<2x4x16x15xf32>
    %28 = arith.subf %26, %27 : vector<2x4x16x15xf32>
    %29 = math.absf %28 : vector<2x4x16x15xf32>
    %30 = vector.shape_cast %29 : vector<2x4x16x15xf32> to vector<1x2x4x16x15xf32>
    %cst_14 = arith.constant dense<0.000000e+00> : vector<1xf32>
    %31 = vector.multi_reduction <add>, %30, %cst_14 [1, 2, 3, 4] : vector<1x2x4x16x15xf32> to vector<1xf32>
    %32 = vector.shape_cast %31 : vector<1xf32> to vector<1x1x1x1x1xf32>
    %33 = vector.extract %32[0, 0, 0, 0, 0] : f32 from vector<1x1x1x1x1xf32>
    %34 = tpu.iota {dimensions = array<i32: 3>} : vector<1x1x8x128xi32>
    %c0_i32 = arith.constant 0 : i32
    %35 = vector.broadcast %c0_i32 : i32 to vector<1x1x8x128xi32>
    %36 = arith.cmpi eq, %34, %35 : vector<1x1x8x128xi32>
    %cst_15 = arith.constant 0.000000e+00 : f32
    %37 = vector.broadcast %10 : f32 to vector<1x1x8x128xf32>
    %38 = vector.broadcast %cst_15 : f32 to vector<1x1x8x128xf32>
    %39 = arith.select %36, %37, %38 : vector<1x1x8x128xi1>, vector<1x1x8x128xf32>
    %c1_i32_16 = arith.constant 1 : i32
    %40 = vector.broadcast %c1_i32_16 : i32 to vector<1x1x8x128xi32>
    %41 = arith.cmpi eq, %34, %40 : vector<1x1x8x128xi32>
    %cst_17 = arith.constant 0.000000e+00 : f32
    %42 = vector.broadcast %25 : f32 to vector<1x1x8x128xf32>
    %43 = vector.broadcast %cst_17 : f32 to vector<1x1x8x128xf32>
    %44 = arith.select %41, %42, %43 : vector<1x1x8x128xi1>, vector<1x1x8x128xf32>
    %45 = arith.addf %39, %44 : vector<1x1x8x128xf32>
    %c2_i32 = arith.constant 2 : i32
    %46 = vector.broadcast %c2_i32 : i32 to vector<1x1x8x128xi32>
    %47 = arith.cmpi eq, %34, %46 : vector<1x1x8x128xi32>
    %cst_18 = arith.constant 0.000000e+00 : f32
    %48 = vector.broadcast %33 : f32 to vector<1x1x8x128xf32>
    %49 = vector.broadcast %cst_18 : f32 to vector<1x1x8x128xf32>
    %50 = arith.select %47, %48, %49 : vector<1x1x8x128xi1>, vector<1x1x8x128xf32>
    %51 = arith.addf %45, %50 : vector<1x1x8x128xf32>
    %c0_19 = arith.constant 0 : index
    %c0_20 = arith.constant 0 : index
    %c0_21 = arith.constant 0 : index
    %c0_22 = arith.constant 0 : index
    %52 = vector.load %arg5[%c0_19, %c0_20, %c0_21, %c0_22] : memref<1x1x8x128xf32, #tpu.memory_space<vmem>>, vector<1x1x8x128xf32>
    tpu.vector_store %arg5[%c0_19, %c0_20, %c0_21, %c0_22], %51 {strides = array<i32>} : memref<1x1x8x128xf32, #tpu.memory_space<vmem>>, vector<1x1x8x128xf32>,
    return
  }
  func.func @transform_0(%arg0: i32, %arg1: i32) -> (i32, i32, i32, i32) {
    %c0_i32 = arith.constant 0 : i32
    %c0_i32_0 = arith.constant 0 : i32
    %c0_i32_1 = arith.constant 0 : i32
    return %arg0, %arg1, %c0_i32, %c0_i32_0 : i32, i32, i32, i32
  }
  func.func @transform_1(%arg0: i32, %arg1: i32) -> (i32, i32, i32, i32) {
    %c0_i32 = arith.constant 0 : i32
    %c0_i32_0 = arith.constant 0 : i32
    %c0_i32_1 = arith.constant 0 : i32
    return %arg0, %arg1, %c0_i32, %c0_i32_0 : i32, i32, i32, i32
  }
  func.func @transform_2(%arg0: i32, %arg1: i32) -> (i32, i32, i32, i32) {
    %c0_i32 = arith.constant 0 : i32
    %c0_i32_0 = arith.constant 0 : i32
    %c0_i32_1 = arith.constant 0 : i32
    %c0_i32_2 = arith.constant 0 : i32
    return %arg0, %c0_i32, %c0_i32_0, %c0_i32_1 : i32, i32, i32, i32
  }
  func.func @transform_3(%arg0: i32, %arg1: i32) -> (i32, i32, i32, i32) {
    %c0_i32 = arith.constant 0 : i32
    %c0_i32_0 = arith.constant 0 : i32
    %c0_i32_1 = arith.constant 0 : i32
    return %arg0, %arg1, %c0_i32, %c0_i32_0 : i32, i32, i32, i32
  }
}

</mosaic_0001>

<bundles_post_ra>
// kernel: tpu_custom_call.1
= control target key start
LH: loop header
LB: loop body
LE: loop exit
PB: predicated region body
PF: predicated region fallthrough
CT: control target
= control target key end

     0   :  { %8 = vsyncpa [#allocation3], 0  ;;  %s1012_s0 = inlined_call_operand.hbm [shape: f32[2,4,16,16], index: 0, kind: input, shape index: {}]   ;;  %s1013_s1 = inlined_call_operand.hbm [shape: f32[2,4,16,16], index: 1, kind: input, shape index: {}]   ;;  %s1014_s2 = inlined_call_operand.hbm [shape: f32[2,1,16,16], index: 2, kind: input, shape index: {}]   ;;  %s1015_s3 = inlined_call_operand.hbm [shape: f32[1,1,8,128], index: 3, kind: output, shape index: {}]  }
   0x1   :  { %9 = vsyncpa [#allocation6], 0 }
   0x2   :  { %10 = vsyncpa [#allocation4], 0  ;;  %s28_s14 = sshll.u32 %s1013_s1, 4  ;;  %s674_s15 = smov [#allocation5]   ;;  %s29_s14 = int_to_ptr.hbm [resolvable:$true] %s28_s14 }
   0x3   :  { %s30_s16 = sshll.u32 %s674_s15, 4  ;;  %s15_s19 = sshll.u32 %s1012_s0, 4  ;;  %s31_s16 = int_to_ptr.vmem [resolvable:$true] %s30_s16  ;;  %s16_s19 = int_to_ptr.hbm [resolvable:$true] %s15_s19 }
   0x4   :  { %s675_s20 = smov 128   ;;  %s676_s21 = smov 8  }
   0x5   :  { %36 = dma.hbm_to_vmem [thread:$0]  %s29_s14, 2048, %s31_s16, [#allocation6], %s675_s20, %s675_s20, %s676_s21  }
   0x6   :  { %s677_s22 = smov [#allocation2]   ;;  %s41_s26 = sshll.u32 %s1014_s2, 4  ;;  %s42_s26 = int_to_ptr.hbm [resolvable:$true] %s41_s26 }
   0x7   :  { %s17_s23 = sshll.u32 %s677_s22, 4  ;;  %s678_s1 = smov [#allocation7]   ;;  %s18_s23 = int_to_ptr.vmem [resolvable:$true] %s17_s23 }
   0x8   :  { %23 = dma.hbm_to_vmem [thread:$0]  %s16_s19, 2048, %s18_s23, [#allocation3], %s675_s20, %s675_s20, %s676_s21  }
   0x9   :  { %s43_s27 = sshll.u32 %s678_s1, 4  ;;  %s44_s27 = int_to_ptr.vmem [resolvable:$true] %s43_s27 }
   0xa   :  { %49 = dma.hbm_to_vmem [thread:$0]  %s42_s26, 512, %s44_s27, [#allocation6], %s675_s20, %s675_s20, %s676_s21  }
   0xb   :  { %668 = dma.done.wait [#allocation3], 2048  }
   0xc   :  { %669 = vsyncadd [#allocation3], 4294965248 }
   0xd   :  { %670 = dma.done.wait [#allocation6], 2560  }
   0xe   :  { %671 = vsyncadd [#allocation6], 4294964736  ;;  %v711_v0 = vld [vmem:[#allocation2 + $0x10] sm:$0xff]  ;;  %s679_s0 = smov 1   ;;  %v715_v1 = vld [vmem:[#allocation2] sm:$0xff]  ;;  %s680_s2 = smov 127   ;;  %v203_v60 = vlaneseq }
   0xf   :  { %345 = vrot.lane.b32.xlu1 %v711_v0, %s679_s0  ;;  %341 = vrot.lane.b32.xlu0 %v715_v1, %s679_s0  ;;  %v719_v2 = vld [vmem:[#allocation2 + $0x20] sm:$0xff]  ;;  %v723_v3 = vld [vmem:[#allocation2 + $0x18] sm:$0xff]  ;;  %v725_v4 = vld [vmem:[#allocation2 + $0x8] sm:$0xff]  ;;  %vm146_vm5 = vcmask 130048   ;;  %vm485_vm6 = vcmask 121856   ;;  %s681_s30 = smov [#allocation8]  }
  0x10   :  { %349 = vrot.lane.b32.xlu2 %v719_v2, %s679_s0  ;;  %v731_v5 = vld [vmem:[#allocation2 + $0x28] sm:$0xff]  ;;  %v735_v6 = vld [vmem:[#allocation2 + $0x38] sm:$0xff]  ;;  %v737_v7 = vld [vmem:[#allocation2 + $0x30] sm:$0xff]  ;;  %s545_s4 = sshll.u32 %s681_s30, 4  ;;  %s547_s8 = sshll.u32 %s1015_s3, 4  ;;  %s546_s4 = int_to_ptr.vmem [resolvable:$true] %s545_s4  ;;  %s548_s8 = int_to_ptr.hbm [resolvable:$true] %s547_s8 }
  0x11   :  { %v743_v8 = vld [vmem:[#allocation2 + $0x40] sm:$0xff]  ;;  %v747_v9 = vld [vmem:[#allocation2 + $0x50] sm:$0xff]  ;;  %v749_v10 = vld [vmem:[#allocation2 + $0x48] sm:$0xff] }
  0x12   :  { %v755_v11 = vld [vmem:[#allocation2 + $0x58] sm:$0xff]  ;;  %v759_v12 = vld [vmem:[#allocation2 + $0x68] sm:$0xff]  ;;  %v761_v13 = vld [vmem:[#allocation2 + $0x60] sm:$0xff] }
  0x13   :  { %v767_v14 = vld [vmem:[#allocation2 + $0x70] sm:$0xff]  ;;  %v771_v15 = vld [vmem:[#allocation2 + $0x78] sm:$0xff] }
  0x17   :  { %347 = vrot.lane.b32.xlu1 %v723_v3, %s679_s0  ;;  %343 = vrot.lane.b32.xlu0 %v725_v4, %s679_s0 }
  0x18   :  { %351 = vrot.lane.b32.xlu2 %v731_v5, %s679_s0 }
  0x1f   :  { %355 = vrot.lane.b32.xlu1 %v735_v6, %s679_s0  ;;  %353 = vrot.lane.b32.xlu0 %v737_v7, %s679_s0 }
  0x20   :  { %357 = vrot.lane.b32.xlu2 %v743_v8, %s679_s0 }
  0x27   :  { %361 = vrot.lane.b32.xlu1 %v747_v9, %s679_s0  ;;  %359 = vrot.lane.b32.xlu0 %v749_v10, %s679_s0 }
  0x28   :  { %363 = vrot.lane.b32.xlu2 %v755_v11, %s679_s0 }
  0x2f   :  { %367 = vrot.lane.b32.xlu1 %v759_v12, %s679_s0  ;;  %365 = vrot.lane.b32.xlu0 %v761_v13, %s679_s0 }
  0x30   :  { %369 = vrot.lane.b32.xlu2 %v767_v14, %s679_s0 }
  0x37   :  { %371 = vrot.lane.b32.xlu0 %v771_v15, %s679_s0 }
  0x6a   :  { %v350_v16 = vpop.permute.xlu2 %349 }
  0x6b   :  { %v393_v34 = vsub.f32 %v719_v2, %v350_v16 }
  0x6d   :  { %v409_v40 = vand.u32 2147483647, %v393_v34  ;;  %v79_v34 = vld [vmem:[#allocation5 + $0x8] sm:$0xff] }
  0x72   :  { %v352_v17 = vpop.permute.xlu2 %351 }
  0x73   :  { %v394_v24 = vsub.f32 %v731_v5, %v352_v17  ;;  %v806_v17 = vshrl.u32 %v203_v60, 7 }
  0x75   :  { %v410_v29 = vand.u32 2147483647, %v394_v24  ;;  %vm205_vm0 = vcmp.lt.s32.totalorder %v806_v17, 7  ;;  %v195_v24 = vrot.slane %v725_v4, 1 }
  0x7a   :  { %v358_v25 = vpop.permute.xlu2 %357 }
  0x7b   :  { %v397_v33 = vsub.f32 %v743_v8, %v358_v25 }
  0x7d   :  { %v413_v38 = vand.u32 2147483647, %v397_v33  ;;  %v78_v33 = vld [vmem:[#allocation5] sm:$0xff] }
  0x81   :  { %v346_v18 = vpop.permute.xlu1 %345  ;;  %v342_v20 = vpop.permute.xlu0 %341 }
  0x82   :  { %v391_v19 = vsub.f32 %v711_v0, %v346_v18  ;;  %v389_v21 = vsub.f32 %v715_v1, %v342_v20  ;;  %v364_v35 = vpop.permute.xlu2 %363  ;;  %v222_v18 = vadd.s32 8, %v806_v17 }
  0x83   :  { %v400_v42 = vsub.f32 %v755_v11, %v364_v35 }
  0x84   :  { %v407_v22 = vand.u32 2147483647, %v391_v19  ;;  %v405_v23 = vand.u32 2147483647, %v389_v21  ;;  %v223_v19 = vrot.slane %v806_v17, 1  ;;  %v224_v20 = vrot.slane %v222_v18, 1 }
  0x85   :  { %v416_v45 = vand.u32 2147483647, %v400_v42  ;;  %v99_v42 = vsub.f32 %v725_v4, %v79_v34 }
  0x86   :  { %441 = vrot.lane.b32.xlu0 %v407_v22, %s680_s2  ;;  %437 = vrot.lane.b32.xlu1 %v405_v23, %s680_s2  ;;  %v225_v21 = vsel %vm205_vm0, %v223_v19, %v224_v20  ;;  %v226_v22 = vsel %vm205_vm0, %v224_v20, %v223_v19  ;;  %v187_v23 = vrot.slane %v715_v1, 1  ;;  %v82_v19 = vld [vmem:[#allocation5 + $0x20] sm:$0xff] }
  0x87   :  { %v227_v25 = vsub.s32 %v225_v21, %v806_v17  ;;  %v190_v21 = vrot.slane %v737_v7, 1 }
  0x89   :  { %v348_v26 = vpop.permute.xlu1 %347  ;;  %v344_v28 = vpop.permute.xlu0 %343  ;;  %vm229_vm1 = vcmp.lt.s32.totalorder %v227_v25, 0 }
  0x8a   :  { %v392_v27 = vsub.f32 %v723_v3, %v348_v26  ;;  %v390_v30 = vsub.f32 %v725_v4, %v344_v28  ;;  %v370_v48 = vpop.permute.xlu2 %369  ;;  %v228_v26 = vsub.s32 %v226_v22, %v222_v18  ;;  %v196_v28 = vrot.slane %v723_v3, 1 }
  0x8b   :  { %v403_v51 = vsub.f32 %v767_v14, %v370_v48 }
  0x8c   :  { %v408_v31 = vand.u32 2147483647, %v392_v27  ;;  %v406_v32 = vand.u32 2147483647, %v390_v30  ;;  %v188_v27 = vrot.slane %v711_v0, 1  ;;  %v214_v30 = vsel %vm205_vm0, %v195_v24, %v187_v23 }
  0x8d   :  { %v419_v54 = vand.u32 2147483647, %v403_v51  ;;  %vm232_vm2 = vcmp.lt.s32.totalorder %v228_v26, 0  ;;  %v81_v51 = vld [vmem:[#allocation5 + $0x18] sm:$0xff] }
  0x8e   :  { %447 = vrot.lane.b32.xlu0 %v410_v29, %s680_s2  ;;  %443 = vrot.lane.b32.xlu1 %v408_v31, %s680_s2  ;;  %v206_v29 = vsel %vm205_vm0, %v187_v23, %v195_v24  ;;  %v230_v31 = vsub.s32 0, %v227_v25 }
  0x8f   :  { %439 = vrot.lane.b32.xlu2 %v406_v32, %s680_s2  ;;  %v233_v32 = vsub.s32 0, %v228_v26  ;;  %v237_v35 = vsub.f32 %v206_v29, %v715_v1  ;;  %v102_v29 = vsub.f32 %v719_v2, %v82_v19 }
  0x91   :  { %v356_v36 = vpop.permute.xlu1 %355  ;;  %v354_v37 = vpop.permute.xlu0 %353 }
  0x92   :  { %v395_v39 = vsub.f32 %v737_v7, %v354_v37  ;;  %v396_v43 = vsub.f32 %v735_v6, %v356_v36  ;;  %v238_v36 = vsub.f32 %v214_v30, %v725_v4  ;;  %v207_v37 = vsel %vm205_vm0, %v188_v27, %v196_v28 }
  0x94   :  { %v411_v41 = vand.u32 2147483647, %v395_v39  ;;  %v412_v49 = vand.u32 2147483647, %v396_v43  ;;  %v832_v39 = vsel %vm232_vm2, %v233_v32, %v228_v26  ;;  %v836_v43 = vld [vmem:[#allocation7] sm:$0xff] }
  0x95   :  { %v254_v48 = vand.u32 2147483647, %v238_v36  ;;  %vm236_vm4 = vcmp.eq.s32.totalorder %v832_v39, 1 }
  0x96   :  { %453 = vrot.lane.b32.xlu0 %v413_v38, %s680_s2  ;;  %449 = vrot.lane.b32.xlu1 %v411_v41, %s680_s2  ;;  %v830_v38 = vsel %vm229_vm1, %v230_v31, %v227_v25  ;;  %v98_v41 = vsub.f32 %v715_v1, %v78_v33  ;;  %v197_v1 = vrot.slane %v731_v5, 1  ;;  %v83_v31 = vld [vmem:[#allocation5 + $0x28] sm:$0xff] }
  0x97   :  { %445 = vrot.lane.b32.xlu2 %v409_v40, %s680_s2  ;;  %v80_v40 = vld [vmem:[#allocation5 + $0x10] sm:$0xff]  ;;  %vm235_vm3 = vcmp.eq.s32.totalorder %v830_v38, 1 }
  0x98   :  { %v100_v4 = vsub.f32 %v711_v0, %v80_v40 }
  0x99   :  { %v360_v44 = vpop.permute.xlu0 %359  ;;  %v362_v46 = vpop.permute.xlu1 %361 }
  0x9a   :  { %v398_v47 = vsub.f32 %v749_v10, %v360_v44  ;;  %v399_v52 = vsub.f32 %v747_v9, %v362_v46  ;;  %v838_v44 = vld [vmem:[#allocation7 + $0x8] sm:$0xff]  ;;  %v239_v46 = vsub.f32 %v207_v37, %v711_v0  ;;  %v116_v0 = vmul.f32 %v100_v4, %v836_v43 }
  0x9c   :  { %v414_v50 = vand.u32 2147483647, %v398_v47  ;;  %v415_v56 = vand.u32 2147483647, %v399_v52  ;;  %v253_v47 = vand.u32 2147483647, %v237_v35  ;;  %v115_v52 = vmul.f32 %v99_v42, %v838_v44 }
  0x9d   :  { %v132_v23 = vand.u32 2147483647, %v116_v0  ;;  %v118_v42 = vmul.f32 %v102_v29, %v836_v43 }
  0x9e   :  { %459 = vrot.lane.b32.xlu0 %v416_v45, %s680_s2  ;;  %455 = vrot.lane.b32.xlu1 %v414_v50, %s680_s2  ;;  %v215_v45 = vsel %vm205_vm0, %v196_v28, %v188_v27  ;;  %v114_v50 = vmul.f32 %v98_v41, %v836_v43 }
  0x9f   :  { %451 = vrot.lane.b32.xlu2 %v412_v49, %s680_s2  ;;  %v189_v49 = vrot.slane %v719_v2, 1  ;;  %v150_v40 = vsel %vm146_vm5, %v132_v23, 0.0 }
  0xa1   :  { %v366_v53 = vpop.permute.xlu0 %365  ;;  %v368_v57 = vpop.permute.xlu1 %367  ;;  %v216_v22 = vsel %vm205_vm0, %v197_v1, %v189_v49 }
  0xa2   :  { %v401_v55 = vsub.f32 %v761_v13, %v366_v53  ;;  %v402_v59 = vsub.f32 %v759_v12, %v368_v57  ;;  %v240_v53 = vsub.f32 %v215_v45, %v723_v3  ;;  %v208_v57 = vsel %vm205_vm0, %v189_v49, %v197_v1  ;;  %v84_v45 = vld [vmem:[#allocation5 + $0x30] sm:$0xff]  ;;  %v85_v1 = vld [vmem:[#allocation5 + $0x38] sm:$0xff] }
  0xa3   :  { %v241_v20 = vsub.f32 %v208_v57, %v719_v2  ;;  %v242_v32 = vsub.f32 %v216_v22, %v731_v5  ;;  %v103_v2 = vsub.f32 %v731_v5, %v83_v31  ;;  %v199_v49 = vrot.slane %v749_v10, 1 }
  0xa4   :  { %v417_v58 = vand.u32 2147483647, %v401_v55  ;;  %v418_v63 = vand.u32 2147483647, %v402_v59  ;;  %v269_v55 = vsel %vm235_vm3, %v253_v47, 0.0  ;;  %v104_v5 = vsub.f32 %v737_v7, %v84_v45  ;;  %v923_v45 = vld [vmem:[#allocation7 + $0x10] sm:$0xff] }
  0xa5   :  { %v130_v59 = vand.u32 2147483647, %v114_v50  ;;  %v257_v33 = vand.u32 2147483647, %v241_v20  ;;  %v191_v50 = vrot.slane %v743_v8, 1  ;;  %v105_v0 = vsub.f32 %v735_v6, %v85_v1  ;;  %v90_v1 = vld [vmem:[#allocation5 + $0x60] sm:$0xff] }
  0xa6   :  { %465 = vrot.lane.b32.xlu0 %v419_v54, %s680_s2  ;;  %461 = vrot.lane.b32.xlu1 %v417_v58, %s680_s2  ;;  %v255_v54 = vand.u32 2147483647, %v239_v46  ;;  %v101_v58 = vsub.f32 %v723_v3, %v81_v51  ;;  %v198_v3 = vrot.slane %v735_v6, 1  ;;  %v258_v46 = vand.u32 2147483647, %v242_v32 }
  0xa7   :  { %457 = vrot.lane.b32.xlu2 %v415_v56, %s680_s2  ;;  %v270_v56 = vsel %vm236_vm4, %v254_v48, 0.0  ;;  %v147_v26 = vsel %vm146_vm5, %v130_v59, 0.0  ;;  %v273_v47 = vsel %vm235_vm3, %v257_v33, 0.0  ;;  %v121_v20 = vmul.f32 %v105_v0, %v838_v44 }
  0xa8   :  { %v271_v18 = vsel %vm235_vm3, %v255_v54, 0.0  ;;  %v117_v24 = vmul.f32 %v101_v58, %v838_v44  ;;  %v209_v34 = vsel %vm205_vm0, %v190_v21, %v198_v3  ;;  %v217_v4 = vsel %vm205_vm0, %v198_v3, %v190_v21 }
  0xa9   :  { %v372_v61 = vpop.permute.xlu0 %371  ;;  %v288_v28 = vsel %vm146_vm5, %v271_v18, 0.0  ;;  %v243_v48 = vsub.f32 %v209_v34, %v737_v7  ;;  %v134_v54 = vand.u32 2147483647, %v118_v42  ;;  %v274_v57 = vsel %vm236_vm4, %v258_v46, 0.0 }
  0xaa   :  { %v404_v62 = vsub.f32 %v771_v15, %v372_v61  ;;  %v131_v61 = vand.u32 2147483647, %v115_v52  ;;  %v133_v35 = vand.u32 2147483647, %v117_v24  ;;  %v244_v58 = vsub.f32 %v217_v4, %v735_v6  ;;  %v86_v24 = vld [vmem:[#allocation5 + $0x40] sm:$0xff] }
  0xab   :  { %v259_v59 = vand.u32 2147483647, %v243_v48  ;;  %v120_v7 = vmul.f32 %v104_v5, %v836_v43  ;;  %v294_v19 = vsel %vm146_vm5, %v274_v57, 0.0  ;;  %v218_v31 = vsel %vm205_vm0, %v199_v49, %v191_v50 }
  0xac   :  { %v420_v16 = vand.u32 2147483647, %v404_v62  ;;  %v285_v62 = vsel %vm146_vm5, %v269_v55, 0.0  ;;  %v148_v27 = vsel %vm146_vm5, %v131_v61, 0.0  ;;  %v152_v51 = vsel %vm146_vm5, %v133_v35, 0.0 }
  0xad   :  { %v149_v36 = vadd.f32 %v148_v27, %v147_v26  ;;  %v119_v55 = vmul.f32 %v103_v2, %v838_v44  ;;  %v210_v61 = vsel %vm205_vm0, %v191_v50, %v199_v49  ;;  %v260_v21 = vand.u32 2147483647, %v244_v58  ;;  %v87_v27 = vld [vmem:[#allocation5 + $0x48] sm:$0xff] }
  0xae   :  { %467 = vrot.lane.b32.xlu1 %v420_v16, %s680_s2  ;;  %v256_v16 = vand.u32 2147483647, %v240_v53  ;;  %v275_v22 = vsel %vm235_vm3, %v259_v59, 0.0  ;;  %v245_v6 = vsub.f32 %v210_v61, %v743_v8  ;;  %v192_v32 = vrot.slane %v747_v9, 1 }
  0xaf   :  { %463 = vrot.lane.b32.xlu2 %v418_v63, %s680_s2  ;;  %v286_v63 = vsel %vm146_vm5, %v270_v56, 0.0  ;;  %v151_v52 = vadd.f32 %v150_v40, %v149_v36  ;;  %v292_v56 = vsel %vm146_vm5, %v273_v47, 0.0  ;;  %v135_v18 = vand.u32 2147483647, %v119_v55 }
  0xb0   :  { %v287_v25 = vadd.f32 %v286_v63, %v285_v62  ;;  %v272_v30 = vsel %vm236_vm4, %v256_v16, 0.0  ;;  %v154_v16 = vsel %vm146_vm5, %v134_v54, 0.0  ;;  %v296_v43 = vsel %vm146_vm5, %v275_v22, 0.0 }
  0xb1   :  { %v290_v41 = vsel %vm146_vm5, %v272_v30, 0.0  ;;  %v153_v62 = vadd.f32 %v152_v51, %v151_v52  ;;  %v156_v26 = vsel %vm146_vm5, %v135_v18, 0.0  ;;  %v276_v29 = vsel %vm236_vm4, %v260_v21, 0.0  ;;  %v89_v51 = vld [vmem:[#allocation5 + $0x58] sm:$0xff] }
  0xb2   :  { %v289_v37 = vadd.f32 %v288_v28, %v287_v25  ;;  %v136_v25 = vand.u32 2147483647, %v120_v7  ;;  %v137_v28 = vand.u32 2147483647, %v121_v20  ;;  %v261_v44 = vand.u32 2147483647, %v245_v6 }
  0xb3   :  { %v155_v3 = vadd.f32 %v154_v16, %v153_v62  ;;  %v106_v30 = vsub.f32 %v743_v8, %v86_v24  ;;  %v200_v33 = vrot.slane %v755_v11, 1  ;;  %v298_v40 = vsel %vm146_vm5, %v276_v29, 0.0  ;;  %v932_v52 = vld [vmem:[#allocation7 + $0x18] sm:$0xff] }
  0xb4   :  { %v291_v53 = vadd.f32 %v290_v41, %v289_v37  ;;  %v158_v36 = vsel %vm146_vm5, %v136_v25, 0.0  ;;  %v107_v37 = vsub.f32 %v749_v10, %v87_v27  ;;  %v88_v41 = vld [vmem:[#allocation5 + $0x50] sm:$0xff]  ;;  %v246_v8 = vsub.f32 %v218_v31, %v749_v10 }
  0xb5   :  { %v157_v34 = vadd.f32 %v156_v26, %v155_v3  ;;  %v219_v42 = vsel %vm205_vm0, %v200_v33, %v192_v32  ;;  %v277_v2 = vsel %vm235_vm3, %v261_v44, 0.0  ;;  %v193_v46 = vrot.slane %v761_v13, 1  ;;  %v91_v3 = vld [vmem:[#allocation5 + $0x68] sm:$0xff] }
  0xb6   :  { %v293_v63 = vadd.f32 %v292_v56, %v291_v53  ;;  %v160_v47 = vsel %vm146_vm5, %v137_v28, 0.0  ;;  %v211_v48 = vsel %vm205_vm0, %v192_v32, %v200_v33  ;;  %v122_v49 = vmul.f32 %v106_v30, %v923_v45  ;;  %v92_v30 = vld [vmem:[#allocation5 + $0x70] sm:$0xff] }
  0xb7   :  { %v108_v50 = vsub.f32 %v747_v9, %v88_v41  ;;  %v248_v10 = vsub.f32 %v219_v42, %v755_v11  ;;  %v159_v53 = vadd.f32 %v158_v36, %v157_v34  ;;  %v300_v5 = vsel %vm146_vm5, %v277_v2, 0.0  ;;  %v93_v41 = vld [vmem:[#allocation5 + $0x78] sm:$0xff] }
  0xb8   :  { %v295_v23 = vadd.f32 %v294_v19, %v293_v63  ;;  %v201_v54 = vrot.slane %v759_v12, 1  ;;  %v123_v55 = vmul.f32 %v107_v37, %v932_v52  ;;  %v138_v56 = vand.u32 2147483647, %v122_v49 }
  0xb9   :  { %v247_v57 = vsub.f32 %v211_v48, %v747_v9  ;;  %v262_v0 = vand.u32 2147483647, %v246_v8  ;;  %v161_v58 = vadd.f32 %v160_v47, %v159_v53  ;;  %v110_v59 = vsub.f32 %v761_v13, %v90_v1 }
  0xba   :  { %v297_v35 = vadd.f32 %v296_v43, %v295_v23  ;;  %v109_v61 = vsub.f32 %v755_v11, %v89_v51  ;;  %v162_v62 = vsel %vm146_vm5, %v138_v56, 0.0  ;;  %v264_v63 = vand.u32 2147483647, %v248_v10 }
  0xbb   :  { %v263_v7 = vand.u32 2147483647, %v247_v57  ;;  %v278_v16 = vsel %vm236_vm4, %v262_v0, 0.0  ;;  %v212_v19 = vsel %vm205_vm0, %v193_v46, %v201_v54  ;;  %v124_v9 = vmul.f32 %v108_v50, %v923_v45 }
  0xbc   :  { %v299_v4 = vadd.f32 %v298_v40, %v297_v35  ;;  %v302_v20 = vsel %vm146_vm5, %v278_v16, 0.0  ;;  %v139_v21 = vand.u32 2147483647, %v123_v55  ;;  %v249_v22 = vsub.f32 %v212_v19, %v761_v13 }
  0xbd   :  { %v279_v11 = vsel %vm235_vm3, %v263_v7, 0.0  ;;  %v163_v23 = vadd.f32 %v162_v62, %v161_v58  ;;  %v194_v24 = vrot.slane %v767_v14, 1  ;;  %v202_v25 = vrot.slane %v771_v15, 1 }
  0xbe   :  { %v301_v18 = vadd.f32 %v300_v5, %v299_v4  ;;  %v220_v26 = vsel %vm205_vm0, %v201_v54, %v193_v46  ;;  %v304_v43 = vsel %vm146_vm5, %v279_v11, 0.0  ;;  %v265_v29 = vand.u32 2147483647, %v249_v22 }
  0xbf   :  { %v250_v28 = vsub.f32 %v220_v26, %v759_v12  ;;  %v280_v13 = vsel %vm236_vm4, %v264_v63, 0.0  ;;  %v213_v31 = vsel %vm205_vm0, %v194_v24, %v202_v25  ;;  %v111_v33 = vsub.f32 %v759_v12, %v91_v3 }
  0xc0   :  { %v303_v6 = vadd.f32 %v302_v20, %v301_v18  ;;  %v306_v32 = vsel %vm146_vm5, %v280_v13, 0.0  ;;  %v125_v34 = vmul.f32 %v109_v61, %v932_v52  ;;  %v251_v35 = vsub.f32 %v213_v31, %v767_v14 }
  0xc1   :  { %v266_v36 = vand.u32 2147483647, %v250_v28  ;;  %v281_v37 = vsel %vm235_vm3, %v265_v29, 0.0  ;;  %v221_v42 = vsel %vm205_vm0, %v202_v25, %v194_v24  ;;  %v112_v2 = vsub.f32 %v767_v14, %v92_v30 }
  0xc2   :  { %v305_v44 = vadd.f32 %v304_v43, %v303_v6  ;;  %v308_v8 = vsel %vm146_vm5, %v281_v37, 0.0  ;;  %v164_v46 = vsel %vm146_vm5, %v139_v21, 0.0  ;;  %v252_v12 = vsub.f32 %v221_v42, %v771_v15 }
  0xc3   :  { %v267_v47 = vand.u32 2147483647, %v251_v35  ;;  %v282_v48 = vsel %vm236_vm4, %v266_v36, 0.0  ;;  %v113_v4 = vsub.f32 %v771_v15, %v93_v41  ;;  %v126_v17 = vmul.f32 %v110_v59, %v923_v45 }
  0xc4   :  { %v307_v40 = vadd.f32 %v306_v32, %v305_v44  ;;  %v310_v1 = vsel %vm146_vm5, %v282_v48, 0.0  ;;  %v140_v50 = vand.u32 2147483647, %v124_v9  ;;  %v268_v51 = vand.u32 2147483647, %v252_v12 }
  0xc5   :  { %v283_v14 = vsel %vm235_vm3, %v267_v47, 0.0  ;;  %v127_v53 = vmul.f32 %v111_v33, %v932_v52  ;;  %v141_v55 = vand.u32 2147483647, %v125_v34  ;;  %v165_v56 = vadd.f32 %v164_v46, %v163_v23 }
  0xc6   :  { %v309_v49 = vadd.f32 %v308_v8, %v307_v40  ;;  %v312_v54 = vsel %vm146_vm5, %v283_v14, 0.0  ;;  %v284_v15 = vsel %vm236_vm4, %v268_v51, 0.0  ;;  %v128_v58 = vmul.f32 %v112_v2, %v923_v45 }
  0xc7   :  { %v142_v59 = vand.u32 2147483647, %v126_v17  ;;  %v314_v61 = vsel %vm146_vm5, %v284_v15, 0.0  ;;  %v129_v7 = vmul.f32 %v113_v4, %v932_v52  ;;  %v143_v16 = vand.u32 2147483647, %v127_v53 }
  0xc8   :  { %v311_v10 = vadd.f32 %v310_v1, %v309_v49  ;;  %v166_v18 = vsel %vm146_vm5, %v140_v50, 0.0  ;;  %v168_v39 = vsel %vm146_vm5, %v141_v55, 0.0  ;;  %v144_v45 = vand.u32 2147483647, %v128_v58 }
  0xc9   :  { %v167_v20 = vadd.f32 %v166_v18, %v165_v56  ;;  %v170_v21 = vsel %vm146_vm5, %v142_v59, 0.0  ;;  %v145_v11 = vand.u32 2147483647, %v129_v7  ;;  %v172_v6 = vsel %vm146_vm5, %v143_v16, 0.0 }
  0xca   :  { %v313_v0 = vadd.f32 %v312_v54, %v311_v10  ;;  %v174_v26 = vsel %vm146_vm5, %v144_v45, 0.0 }
  0xcb   :  { %v169_v22 = vadd.f32 %v168_v39, %v167_v20  ;;  %v176_v13 = vsel %vm146_vm5, %v145_v11, 0.0 }
  0xcc   :  { %v315_v63 = vadd.f32 %v314_v61, %v313_v0 }
  0xcd   :  { %v171_v23 = vadd.f32 %v170_v21, %v169_v22 }
  0xd0   :  { %316 = vadd.xlane.f32.xlu0 %v315_v63 }
  0xe9   :  { %v440_v27 = vpop.permute.xlu2 %439 }
  0xea   :  { %v487_v19 = vsel %vm485_vm6, %v440_v27, 0.0  ;;  %v173_v27 = vadd.f32 %v172_v6, %v171_v23 }
  0xec   :  { %v175_v30 = vadd.f32 %v174_v26, %v173_v27 }
  0xee   :  { %v177_v33 = vadd.f32 %v176_v13, %v175_v30 }
  0xf0   :  { %178 = vadd.xlane.f32.xlu2 %v177_v33 }
  0xf1   :  { %v446_v62 = vpop.permute.xlu2 %445 }
  0xf2   :  { %v493_v44 = vsel %vm485_vm6, %v446_v62, 0.0 }
  0xf8   :  { %v442_v5 = vpop.permute.xlu0 %441  ;;  %v438_v57 = vpop.permute.xlu1 %437 }
  0xf9   :  { %v486_v38 = vsel %vm485_vm6, %v438_v57, 0.0  ;;  %v489_v3 = vsel %vm485_vm6, %v442_v5, 0.0  ;;  %v452_v29 = vpop.permute.xlu2 %451 }
  0xfa   :  { %v488_v9 = vadd.f32 %v487_v19, %v486_v38  ;;  %v499_v40 = vsel %vm485_vm6, %v452_v29, 0.0 }
  0xfc   :  { %v490_v24 = vadd.f32 %v489_v3, %v488_v9 }
 0x100   :  { %v448_v52 = vpop.permute.xlu0 %447  ;;  %v444_v25 = vpop.permute.xlu1 %443 }
 0x101   :  { %v491_v43 = vsel %vm485_vm6, %v444_v25, 0.0  ;;  %v495_v32 = vsel %vm485_vm6, %v448_v52, 0.0  ;;  %v458_v8 = vpop.permute.xlu2 %457  ;;  %v527_v25 = vand.u32 127, %v203_v60 }
 0x102   :  { %v492_v28 = vadd.f32 %v491_v43, %v490_v24  ;;  %v505_v49 = vsel %vm485_vm6, %v458_v8, 0.0 }
 0x103   :  { %vm528_vm7 = vcmp.eq.s32.totalorder %v527_v25, 0  ;;  %vm531_vm8 = vcmp.eq.s32.totalorder %v527_v25, 1  ;;  %vm535_vm9 = vcmp.eq.s32.totalorder %v527_v25, 2 }
 0x104   :  { %v494_v31 = vadd.f32 %v493_v44, %v492_v28 }
 0x106   :  { %v496_v35 = vadd.f32 %v495_v32, %v494_v31 }
 0x108   :  { %v454_v34 = vpop.permute.xlu0 %453  ;;  %v450_v36 = vpop.permute.xlu1 %449 }
 0x109   :  { %v497_v37 = vsel %vm485_vm6, %v450_v36, 0.0  ;;  %v501_v2 = vsel %vm485_vm6, %v454_v34, 0.0  ;;  %v464_v50 = vpop.permute.xlu2 %463 }
 0x10a   :  { %v498_v41 = vadd.f32 %v497_v37, %v496_v35  ;;  %v511_v53 = vsel %vm485_vm6, %v464_v50, 0.0 }
 0x10c   :  { %v500_v42 = vadd.f32 %v499_v40, %v498_v41 }
 0x10e   :  { %v502_v46 = vadd.f32 %v501_v2, %v500_v42 }
 0x110   :  { %v456_v12 = vpop.permute.xlu1 %455  ;;  %v460_v47 = vpop.permute.xlu0 %459 }
 0x111   :  { %v503_v48 = vsel %vm485_vm6, %v456_v12, 0.0  ;;  %v507_v17 = vsel %vm485_vm6, %v460_v47, 0.0 }
 0x112   :  { %v504_v1 = vadd.f32 %v503_v48, %v502_v46 }
 0x114   :  { %v506_v4 = vadd.f32 %v505_v49, %v504_v1 }
 0x116   :  { %v508_v51 = vadd.f32 %v507_v17, %v506_v4 }
 0x118   :  { %v462_v14 = vpop.permute.xlu1 %461  ;;  %v466_v54 = vpop.permute.xlu0 %465 }
 0x119   :  { %v509_v10 = vsel %vm485_vm6, %v462_v14, 0.0  ;;  %v513_v56 = vsel %vm485_vm6, %v466_v54, 0.0 }
 0x11a   :  { %v510_v5 = vadd.f32 %v509_v10, %v508_v51 }
 0x11c   :  { %v512_v55 = vadd.f32 %v511_v53, %v510_v5 }
 0x11e   :  { %v514_v57 = vadd.f32 %v513_v56, %v512_v55 }
 0x120   :  { %v468_v15 = vpop.permute.xlu1 %467 }
 0x121   :  { %v515_v0 = vsel %vm485_vm6, %v468_v15, 0.0 }
 0x122   :  { %v516_v58 = vadd.f32 %v515_v0, %v514_v57 }
 0x124   :  { %517 = vadd.xlane.f32.xlu1 %v516_v58 }
 0x143   :  { %v317_v59 = vpop.xlane.xlu0 %316 }
 0x144   :  { %v318_v38 = vrot.slane %v317_v59, 4 }
 0x146   :  { %v319_v61 = vadd.f32 %v318_v38, %v317_v59 }
 0x148   :  { %v320_v62 = vrot.slane %v319_v61, 2 }
 0x14a   :  { %v321_v16 = vadd.f32 %v320_v62, %v319_v61 }
 0x14c   :  { %v322_v20 = vrot.slane %v321_v16, 1 }
 0x14e   :  { %v323_v45 = vadd.f32 %v322_v20, %v321_v16 }
 0x163   :  { %v179_v63 = vpop.xlane.xlu2 %178 }
 0x164   :  { %v180_v7 = vrot.slane %v179_v63, 4 }
 0x166   :  { %v181_v18 = vadd.f32 %v180_v7, %v179_v63 }
 0x168   :  { %v182_v19 = vrot.slane %v181_v18, 2 }
 0x16a   :  { %v183_v39 = vadd.f32 %v182_v19, %v181_v18 }
 0x16c   :  { %v184_v9 = vrot.slane %v183_v39, 1 }
 0x16e   :  { %v185_v21 = vadd.f32 %v184_v9, %v183_v39 }
 0x170   :  { %558 = vpush %v185_v21 }
 0x171   :  { %560 = vpush %v323_v45 }
 0x197   :  { %v518_v22 = vpop.xlane.xlu1 %517 }
 0x198   :  { %v519_v11 = vrot.slane %v518_v22, 4 }
 0x19a   :  { %v520_v6 = vadd.f32 %v519_v11, %v518_v22 }
 0x19c   :  { %v521_v3 = vrot.slane %v520_v6, 2 }
 0x19e   :  { %v522_v52 = vadd.f32 %v521_v3, %v520_v6 }
 0x1a0   :  { %v523_v23 = vrot.slane %v522_v52, 1 }
 0x1a1   :  { %s559_s28 = spop %558 }
 0x1a2   :  { %v524_v24 = vadd.f32 %v523_v23, %v522_v52  ;;  %s561_s29 = spop %560  ;;  %v529_v26 = vstv %s559_s28 }
 0x1a3   :  { %v532_v43 = vstv %s561_s29  ;;  %v530_v27 = vsel %vm528_vm7, %v529_v26, 0.0 }
 0x1a4   :  { %562 = vpush %v524_v24  ;;  %v533_v28 = vsel %vm531_vm8, %v532_v43, 0.0 }
 0x1a5   :  { %v534_v29 = vadd.f32 %v533_v28, %v530_v27 }
 0x1d5   :  { %s563_s5 = spop %562 }
 0x1d6   :  { %v536_v13 = vstv %s563_s5 }
 0x1d7   :  { %v537_v44 = vsel %vm535_vm9, %v536_v13, 0.0 }
 0x1d8   :  { %v538_v30 = vadd.f32 %v537_v44, %v534_v29 }
 0x1da   :  { %539 = vst [vmem:[#allocation8] sm:$0xff] %v538_v30 }
 0x1db   :  { %550 = dma.vmem_to_hbm [thread:$0]  %s546_s4, 128, %s548_s8, [#allocation4]  }
 0x1dc   :  { %672 = dma.done.wait [#allocation4], 128  }
 0x1dd   :  { %673 = vsyncadd [#allocation4], 4294967168 }
 0x1de   :  { %555 = vsyncpa [#allocation3], 1 }
 0x1df   :  { %556 = vsyncpa [#allocation6], 1 }
 0x1e0   :  { %557 = vsyncpa [#allocation4], 1 }

</bundles_post_ra>
